<compile_context>
chip_gen: v7x
topology: tpu7x:2x2x1
jax: 0.10.0
libtpu: 0.0.40
codegen_flags: <defaults>
</compile_context>

<pallas_src>
import functools

import jax
import jax.numpy as jnp
import numpy as np
from jax.experimental import pallas as pl
from jax.experimental.pallas import tpu as pltpu


def _interp_matrix_np(in_size: int, out_size: int) -> np.ndarray:
    """1-D bilinear align_corners=True interpolation matrix of shape (out_size, in_size)."""
    if out_size == 1:                      # guard: (out_size - 1) == 0 -> sample first pixel
        src = np.zeros((1,), dtype=np.float64)
    else:
        src = np.arange(out_size, dtype=np.float64) * (in_size - 1) / (out_size - 1)
    i0 = np.clip(np.floor(src).astype(np.int64), 0, in_size - 1)
    i1 = np.minimum(i0 + 1, in_size - 1)
    frac = (src - i0).astype(np.float32)
    m = np.zeros((out_size, in_size), dtype=np.float32)
    rows = np.arange(out_size)
    m[rows, i0] += 1.0 - frac
    m[rows, i1] += frac
    return m


def _bilinear_kernel(x_ref, ah_ref, awt_ref, o_ref, *, tb, H, W, OH, OW):
    """x_ref: (tb, H, W)   ah_ref: (OH, H)   awt_ref: (W, OW)   o_ref: (tb, OH, OW)."""
    x = x_ref[...]                                        # (tb, H, W)
    ah = ah_ref[...]                                      # (OH, H)
    awt = awt_ref[...]                                    # (W, OW)

    # W-pass: ONE matmul over the whole block. (tb,H,W)->(tb*H,W) is a leading-dim
    # merge (row-major, last dim unchanged) -> no relayout, no transpose.
    t = jnp.dot(x.reshape(tb * H, W), awt,
                preferred_element_type=jnp.float32)       # (tb*H, OW) f32 accum

    # H-pass: ONE batched matmul with the image axis as the batch dim (no Python unroll).
    t3 = t.reshape(tb, H, OW).astype(ah.dtype)            # free leading-dim split
    ah_b = jnp.broadcast_to(ah, (tb, OH, H))              # broadcast once per grid step
    out = jax.lax.dot_general(
        ah_b, t3,
        dimension_numbers=(((2,), (1,)), ((0,), (0,))),   # contract over H, batch over tb
        preferred_element_type=jnp.float32)               # (tb, OH, OW)

    o_ref[...] = out.astype(o_ref.dtype)                  # single whole-slab store


def _round_up(a: int, b: int) -> int:
    return (a + b - 1) // b * b


def _pick_tb(nc: int, H: int, W: int, OH: int, OW: int) -> int:
    """Images per grid step, sized from a VMEM byte budget (lane padding included)."""
    lane = 128
    per_img_bytes = (
        2 * H * _round_up(W, lane)        # double-buffered input block
        + 2 * OH * _round_up(OW, lane)    # double-buffered output block
        + H * _round_up(OW, lane)         # W-pass intermediate
        + OH * _round_up(H, lane)         # broadcast A_h
        + OH * _round_up(OW, lane)        # H-pass result before the store
    ) * 4                                 # budget in f32 bytes (conservative for bf16)
    budget = 28 * 1024 * 1024             # keep blocks well under the 48 MiB vmem limit
    tb = max(1, budget // per_img_bytes)
    if tb >= 8:
        tb = (tb // 8) * 8                # sublane-friendly
    tb = min(tb, 512)                     # keep per-step latency / compile size sane
    return int(min(nc, tb))


def interpolate_bilinear_align_corners(x, size):
    """x: (N, C, H, W) -> (N, C, OH, OW); bilinear, align_corners=True (PyTorch semantics)."""
    N, C, H, W = x.shape
    if isinstance(size, int):
        OH = OW = int(size)
    else:
        OH, OW = (int(s) for s in size)

    # bf16 inputs keep bf16 operands on the MXU (f32 accumulation); everything else runs f32.
    cdt = jnp.bfloat16 if x.dtype == jnp.bfloat16 else jnp.float32
    ah = jnp.asarray(_interp_matrix_np(H, OH), dtype=cdt)        # (OH, H)
    awt = jnp.asarray(_interp_matrix_np(W, OW).T, dtype=cdt)     # (W, OW)

    nc = N * C
    xr = x.reshape(nc, H, W)                                     # free reshape, no transpose

    tb = _pick_tb(nc, H, W, OH, OW)
    grid = (pl.cdiv(nc, tb),)                                    # ragged last block is masked

    out = pl.pallas_call(
        functools.partial(_bilinear_kernel, tb=tb, H=H, W=W, OH=OH, OW=OW),
        out_shape=jax.ShapeDtypeStruct((nc, OH, OW), x.dtype),
        grid=grid,
        in_specs=[
            pl.BlockSpec((tb, H, W), lambda i: (i, 0, 0)),       # streamed image block
            pl.BlockSpec((OH, H), lambda i: (0, 0)),             # constant A_h (not re-DMA'd)
            pl.BlockSpec((W, OW), lambda i: (0, 0)),             # constant A_w^T
        ],
        out_specs=pl.BlockSpec((tb, OH, OW), lambda i: (i, 0, 0)),
        compiler_params=pltpu.CompilerParams(
            dimension_semantics=("parallel",),                   # disjoint blocks -> 2-TC shard
            vmem_limit_bytes=48 * 1024 * 1024,                   # v7x-safe, big enough elsewhere
        ),
    )(xr, ah, awt)
    return out.reshape(N, C, OH, OW)


class Interpolate:
    """Mirror of the PyTorch module: Interpolate(size, mode), forward uses align_corners=True."""

    def __init__(self, size, mode):
        assert mode == "bilinear", "only mode='bilinear' is implemented"
        self.size = size if isinstance(size, int) else tuple(size)
        self.mode = mode

    def __call__(self, x):
        return interpolate_bilinear_align_corners(x, self.size)


def _reference_np(x, size):
    """Direct per-pixel bilinear align_corners=True reference (numpy, f32)."""
    x = np.asarray(x, dtype=np.float32)
    N, C, H, W = x.shape
    OH, OW = size

    def coords(inn, out):
        if out == 1:
            return np.zeros((1,), dtype=np.float64)
        return np.arange(out, dtype=np.float64) * (inn - 1) / (out - 1)

    sy, sx = coords(H, OH), coords(W, OW)
    y0 = np.clip(np.floor(sy).astype(np.int64), 0, H - 1)
    y1 = np.minimum(y0 + 1, H - 1)
    fy = (sy - y0)[None, None, :, None]
    x0 = np.clip(np.floor(sx).astype(np.int64), 0, W - 1)
    x1 = np.minimum(x0 + 1, W - 1)
    fx = (sx - x0)[None, None, None, :]

    v00 = x[:, :, y0][:, :, :, x0]
    v01 = x[:, :, y0][:, :, :, x1]
    v10 = x[:, :, y1][:, :, :, x0]
    v11 = x[:, :, y1][:, :, :, x1]
    return (v00 * (1 - fy) * (1 - fx) + v01 * (1 - fy) * fx
            + v10 * fy * (1 - fx) + v11 * fy * fx).astype(np.float32)


if __name__ == "__main__":
    key = jax.random.PRNGKey(0)
    x = jax.random.normal(key, (2, 4, 16, 16), jnp.float32)   # NCHW input, like the module

    module = Interpolate(size=(32, 32), mode="bilinear")
    fwd = jax.jit(module.__call__)
    out = jax.block_until_ready(fwd(x))

    assert out.shape == (2, 4, 32, 32), out.shape
    assert bool(jnp.isfinite(out).all())

    # Check against a direct per-pixel reference. Tolerance covers MXU f32 rounding;
    # real indexing/weight bugs would produce O(1) errors.
    ref = _reference_np(np.asarray(x), (32, 32))
    err = float(np.max(np.abs(np.asarray(out) - ref)))
    assert err < 2e-2, err

    print("KERNEL_OK")
</pallas_src>

<mosaic_0001>
module attributes {stable_mosaic.version = 11 : i64} {
  func.func @_bilinear_kernel(%arg0: i32, %arg1: memref<8x16x16xf32, #tpu.memory_space<vmem>>, %arg2: memref<32x16xf32, #tpu.memory_space<vmem>>, %arg3: memref<16x32xf32, #tpu.memory_space<vmem>>, %arg4: memref<8x32x32xf32, #tpu.memory_space<vmem>>) attributes {dimension_semantics = [#tpu.dimension_semantics<parallel>], iteration_bounds = array<i64: 1>, scalar_prefetch = 0 : i64, scratch_operands = 0 : i64, tpu.core_type = #tpu.core_type<tc>, window_params = [{transform_indices = @transform_0, window_bounds = array<i64: 8, 16, 16>}, {pipeline_mode = #tpu.pipeline_mode<synchronous>, transform_indices = @transform_1, window_bounds = array<i64: 32, 16>}, {pipeline_mode = #tpu.pipeline_mode<synchronous>, transform_indices = @transform_2, window_bounds = array<i64: 16, 32>}, {transform_indices = @transform_3, window_bounds = array<i64: 8, 32, 32>}]} {
    %c0 = arith.constant 0 : index
    %c0_0 = arith.constant 0 : index
    %c0_1 = arith.constant 0 : index
    %0 = vector.load %arg1[%c0, %c0_0, %c0_1] : memref<8x16x16xf32, #tpu.memory_space<vmem>>, vector<8x16x16xf32>
    %c0_2 = arith.constant 0 : index
    %c0_3 = arith.constant 0 : index
    %1 = vector.load %arg2[%c0_2, %c0_3] : memref<32x16xf32, #tpu.memory_space<vmem>>, vector<32x16xf32>
    %c0_4 = arith.constant 0 : index
    %c0_5 = arith.constant 0 : index
    %2 = vector.load %arg3[%c0_4, %c0_5] : memref<16x32xf32, #tpu.memory_space<vmem>>, vector<16x32xf32>
    %3 = vector.shape_cast %0 : vector<8x16x16xf32> to vector<128x16xf32>
    %cst = arith.constant dense<0.000000e+00> : vector<128x32xf32>
    %4 = tpu.matmul %3, %2, %cst {dimension_numbers = #tpu.dot_dimension_numbers<[1], [0], [0], [1], [0, 0, 1, 1], [], []>} : vector<128x16xf32>, vector<16x32xf32>, vector<128x32xf32> -> vector<128x32xf32>
    %5 = vector.shape_cast %4 : vector<128x32xf32> to vector<8x16x32xf32>
    %6 = vector.shape_cast %1 : vector<32x16xf32> to vector<1x32x16xf32>
    %7 = vector.broadcast %6 : vector<1x32x16xf32> to vector<8x32x16xf32>
    %cst_6 = arith.constant dense<0.000000e+00> : vector<8x32x32xf32>
    %8 = tpu.matmul %7, %5, %cst_6 {dimension_numbers = #tpu.dot_dimension_numbers<[2], [1], [1], [2], [0, 0, 0, 1, 1, 2], [0], [0]>} : vector<8x32x16xf32>, vector<8x16x32xf32>, vector<8x32x32xf32> -> vector<8x32x32xf32>
    %c0_7 = arith.constant 0 : index
    %c0_8 = arith.constant 0 : index
    %c0_9 = arith.constant 0 : index
    %9 = vector.load %arg4[%c0_7, %c0_8, %c0_9] : memref<8x32x32xf32, #tpu.memory_space<vmem>>, vector<8x32x32xf32>
    tpu.vector_store %arg4[%c0_7, %c0_8, %c0_9], %8 {strides = array<i32>} : memref<8x32x32xf32, #tpu.memory_space<vmem>>, vector<8x32x32xf32>,
    return
  }
  func.func @transform_0(%arg0: i32) -> (i32, i32, i32) {
    %c0_i32 = arith.constant 0 : i32
    %c0_i32_0 = arith.constant 0 : i32
    %c0_i32_1 = arith.constant 0 : i32
    return %arg0, %c0_i32, %c0_i32_0 : i32, i32, i32
  }
  func.func @transform_1(%arg0: i32) -> (i32, i32) {
    %c0_i32 = arith.constant 0 : i32
    %c0_i32_0 = arith.constant 0 : i32
    %c0_i32_1 = arith.constant 0 : i32
    return %c0_i32, %c0_i32_0 : i32, i32
  }
  func.func @transform_2(%arg0: i32) -> (i32, i32) {
    %c0_i32 = arith.constant 0 : i32
    %c0_i32_0 = arith.constant 0 : i32
    %c0_i32_1 = arith.constant 0 : i32
    return %c0_i32, %c0_i32_0 : i32, i32
  }
  func.func @transform_3(%arg0: i32) -> (i32, i32, i32) {
    %c0_i32 = arith.constant 0 : i32
    %c0_i32_0 = arith.constant 0 : i32
    %c0_i32_1 = arith.constant 0 : i32
    return %arg0, %c0_i32, %c0_i32_0 : i32, i32, i32
  }
}

</mosaic_0001>

<bundles_post_ra>
// kernel: a_call__.1
= control target key start
LH: loop header
LB: loop body
LE: loop exit
PB: predicated region body
PF: predicated region fallthrough
CT: control target
= control target key end

     0   :  { %8 = vsyncpa [#allocation3], 0  ;;  %s1566_s0 = inlined_call_operand.hbm [shape: f32[8,16,16], index: 0, kind: input, shape index: {}]   ;;  %s1567_s1 = inlined_call_operand.hbm [shape: f32[32,16], index: 1, kind: input, shape index: {}]   ;;  %s1568_s2 = inlined_call_operand.hbm [shape: f32[16,32], index: 2, kind: input, shape index: {}]   ;;  %s1569_s3 = inlined_call_operand.hbm [shape: f32[8,32,32], index: 3, kind: output, shape index: {}]  }
   0x1   :  { %9 = vsyncpa [#allocation6], 0 }
   0x2   :  { %10 = vsyncpa [#allocation4], 0  ;;  %s1373_s12 = smov [#allocation5]   ;;  %s1374_s14 = smov [#allocation2]  }
   0x3   :  { %s28_s13 = sshll.u32 %s1373_s12, 4  ;;  %s16_s15 = sshll.u32 %s1374_s14, 4  ;;  %s29_s13 = int_to_ptr.vmem [resolvable:$true] %s28_s13  ;;  %s1399_s15 = int_to_ptr.vmem [resolvable:$true] %s16_s15 }
   0x4   :  { %s1279_s18 = scalar_lea.hbm %s1567_s1, 512 }
   0x5   :  { %p1280_p0 = scmp.ne.s32.totalorder %s1567_s1, %s1279_s18  ;;  %p1283_p1 = scmp.lt.u32.totalorder %s1279_s18, %s1567_s1 }
   0x7   :  { %p1285_p2 = pnand %p1283_p1, %p1280_p0 }
   0x9   :  { %1288 = shalt.err (!%p1285_p2)
}
   0xa   :  { %s1289_s23 = scalar_lea.vmem %s29_s13, 512  ;;  %p1294_p4 = scmp.lt.s32.totalorder %s29_s13, %s29_s13 }
   0xb   :  { %p1290_p3 = scmp.ne.s32.totalorder %s29_s13, %s1289_s23  ;;  %p1295_p5 = scmp.lt.s32.totalorder %s1289_s23, %s1289_s23 }
   0xd   :  { %p1296_p6 = por %p1295_p5, %p1294_p4 }
   0xf   :  { %p1297_p7 = pnand %p1296_p6, %p1290_p3 }
  0x11   :  { %1300 = shalt.err (!%p1297_p7)
}
  0x12   :  { %s1375_s24 = smov 128   ;;  %s1376_s25 = smov 8  }
  0x13   :  { %34 = dma.hbm_to_vmem [thread:$0]  %s1567_s1, 512, %s29_s13, [#allocation6], %s1375_s24, %s1375_s24, %s1376_s25  }
  0x14   :  { %s1301_s30 = scalar_lea.hbm %s1566_s0, 2048 }
  0x15   :  { %p1302_p8 = scmp.ne.s32.totalorder %s1566_s0, %s1301_s30  ;;  %p1305_p9 = scmp.lt.u32.totalorder %s1301_s30, %s1566_s0 }
  0x17   :  { %p1307_p10 = pnand %p1305_p9, %p1302_p8 }
  0x19   :  { %1310 = shalt.err (!%p1307_p10)
}
  0x1a   :  { %s1311_s8 = scalar_lea.vmem %s1399_s15, 2048  ;;  %p1316_p12 = scmp.lt.s32.totalorder %s1399_s15, %s1399_s15 }
  0x1b   :  { %p1312_p11 = scmp.ne.s32.totalorder %s1399_s15, %s1311_s8  ;;  %p1317_p13 = scmp.lt.s32.totalorder %s1311_s8, %s1311_s8 }
  0x1d   :  { %p1318_p0 = por %p1317_p13, %p1316_p12 }
  0x1f   :  { %p1319_p1 = pnand %p1318_p0, %p1312_p11 }
  0x21   :  { %1322 = shalt.err (!%p1319_p1)
}
  0x22   :  { %22 = dma.hbm_to_vmem [thread:$0]  %s1566_s0, 2048, %s1399_s15, [#allocation3], %s1375_s24, %s1375_s24, %s1376_s25  }
  0x23   :  { %s1377_s10 = smov [#allocation7]   ;;  %s1323_s14 = scalar_lea.hbm %s1568_s2, 256 }
  0x24   :  { %s40_s11 = sshll.u32 %s1377_s10, 4  ;;  %p1324_p2 = scmp.ne.s32.totalorder %s1568_s2, %s1323_s14  ;;  %s41_s11 = int_to_ptr.vmem [resolvable:$true] %s40_s11 }
  0x25   :  { %p1327_p3 = scmp.lt.u32.totalorder %s1323_s14, %s1568_s2 }
  0x27   :  { %p1329_p4 = pnand %p1327_p3, %p1324_p2 }
  0x29   :  { %1332 = shalt.err (!%p1329_p4)
}
  0x2a   :  { %s1333_s20 = scalar_lea.vmem %s41_s11, 256  ;;  %p1338_p6 = scmp.lt.s32.totalorder %s41_s11, %s41_s11 }
  0x2b   :  { %p1334_p5 = scmp.ne.s32.totalorder %s41_s11, %s1333_s20  ;;  %p1339_p7 = scmp.lt.s32.totalorder %s1333_s20, %s1333_s20 }
  0x2d   :  { %p1340_p8 = por %p1339_p7, %p1338_p6 }
  0x2f   :  { %p1341_p9 = pnand %p1340_p8, %p1334_p5 }
  0x31   :  { %1344 = shalt.err (!%p1341_p9)
}
  0x32   :  { %46 = dma.hbm_to_vmem [thread:$0]  %s1568_s2, 256, %s41_s11, [#allocation6], %s1375_s24, %s1375_s24, %s1376_s25  }
  0x33   :  { %1367 = dma.done.wait [#allocation3], 2048  }
  0x34   :  { %1368 = vsyncadd [#allocation3], 4294965248 }
  0x35   :  { %1369 = dma.done.wait [#allocation6], 768  }
  0x36   :  { %1370 = vsyncadd [#allocation6], 4294966528  ;;  %vm78_vm0 = vcmask 130048   ;;  %v76_v0 = vld [vmem:[#allocation7] sm:$0xff]  ;;  %v77_v1 = vld [vmem:[#allocation7 + $0x8] sm:$0xff]  ;;  %vm964_vm1 = vcmask 261120  }
  0x37   :  { %v56_v2 = vld [vmem:[#allocation2] sm:$0xff]  ;;  %v1237_v3 = vpack.c.bf16 %v77_v1, %v76_v0  ;;  %v57_v4 = vld [vmem:[#allocation2 + $0x8] sm:$0xff]  ;;  %v58_v5 = vld [vmem:[#allocation2 + $0x10] sm:$0xff]  ;;  %s1378_s2 = smov [#allocation8]  }
  0x38   :  { %1133 = vmatprep.mubr.msk.f32.mxu0 %vm78_vm0, %v56_v2  ;;  %v59_v6 = vld [vmem:[#allocation2 + $0x18] sm:$0xff]  ;;  %v60_v7 = vld [vmem:[#allocation2 + $0x20] sm:$0xff]  ;;  %v61_v8 = vld [vmem:[#allocation2 + $0x28] sm:$0xff]  ;;  %s1002_s21 = sshll.u32 %s1378_s2, 4  ;;  %s1003_s21 = int_to_ptr.vmem [resolvable:$true] %s1002_s21 }
  0x39   :  { %1238 = vmatprep.subr.bf16.mxu0 %v1237_v3  ;;  %v62_v9 = vld [vmem:[#allocation2 + $0x30] sm:$0xff]  ;;  %v63_v10 = vld [vmem:[#allocation2 + $0x38] sm:$0xff]  ;;  %v64_v11 = vld [vmem:[#allocation2 + $0x40] sm:$0xff]  ;;  %s1345_s22 = scalar_lea.vmem %s1003_s21, 4096  ;;  %p1350_p11 = scmp.lt.s32.totalorder %s1003_s21, %s1003_s21 }
  0x3a   :  { %1240 = vmatpush3.bf16.msra.mxu0 %v1237_v3  ;;  %v65_v12 = vld [vmem:[#allocation2 + $0x48] sm:$0xff]  ;;  %v66_v13 = vld [vmem:[#allocation2 + $0x50] sm:$0xff]  ;;  %v67_v14 = vld [vmem:[#allocation2 + $0x58] sm:$0xff]  ;;  %p1346_p10 = scmp.ne.s32.totalorder %s1003_s21, %s1345_s22  ;;  %p1351_p12 = scmp.lt.s32.totalorder %s1345_s22, %s1345_s22 }
  0x3b   :  { %v68_v15 = vld [vmem:[#allocation2 + $0x60] sm:$0xff]  ;;  %v69_v16 = vld [vmem:[#allocation2 + $0x68] sm:$0xff]  ;;  %v70_v17 = vld [vmem:[#allocation2 + $0x70] sm:$0xff] }
  0x3c   :  { %v71_v18 = vld [vmem:[#allocation2 + $0x78] sm:$0xff]  ;;  %v1467_v19 = vld [vmem:[#allocation5] sm:$0xff]  ;;  %v1473_v25 = vld [vmem:[#allocation5 + $0x8] sm:$0xff]  ;;  %p1352_p13 = por %p1351_p12, %p1350_p11 }
  0x3d   :  { %1134 = vmatmul.mubr.msk.f32.vlgmr.msra.gmra.mrb[0].mxu0 %vm78_vm0, %v57_v4  ;;  %1161 = vmatprep.mubr.msk.f32.mxu1 %vm78_vm0, %v1467_v19  ;;  %v74_v27 = vld [vmem:[#allocation5 + $0x10] sm:$0xff]  ;;  %v75_v30 = vld [vmem:[#allocation5 + $0x18] sm:$0xff] }
  0x3e   :  { %1136 = vmatprep.mubr.msk.f32.mxu0 %vm78_vm0, %v58_v5  ;;  %p1353_p0 = pnand %p1352_p13, %p1346_p10 }
  0x41   :  { %1137 = vmatmul.mubr.msk.f32.gmra.mrb[2].mxu0 %vm78_vm0, %v59_v6 }
  0x42   :  { %1139 = vmatprep.mubr.msk.f32.mxu0 %vm78_vm0, %v60_v7 }
  0x45   :  { %1140 = vmatmul.mubr.msk.f32.gmra.mrb[4].mxu0 %vm78_vm0, %v61_v8 }
  0x46   :  { %1142 = vmatprep.mubr.msk.f32.mxu0 %vm78_vm0, %v62_v9 }
  0x49   :  { %1143 = vmatmul.mubr.msk.f32.gmra.mrb[6].mxu0 %vm78_vm0, %v63_v10 }
  0x4a   :  { %1145 = vmatprep.mubr.msk.f32.mxu0 %vm78_vm0, %v64_v11 }
  0x4d   :  { %1146 = vmatmul.mubr.msk.f32.gmra.mrb[8].mxu0 %vm78_vm0, %v65_v12 }
  0x4e   :  { %1148 = vmatprep.mubr.msk.f32.mxu0 %vm78_vm0, %v66_v13 }
  0x51   :  { %1149 = vmatmul.mubr.msk.f32.gmra.mrb[10].mxu0 %vm78_vm0, %v67_v14 }
  0x52   :  { %1151 = vmatprep.mubr.msk.f32.mxu0 %vm78_vm0, %v68_v15 }
  0x55   :  { %1152 = vmatmul.mubr.msk.f32.gmra.mrb[12].mxu0 %vm78_vm0, %v69_v16 }
  0x56   :  { %1154 = vmatprep.mubr.msk.f32.mxu0 %vm78_vm0, %v70_v17 }
  0x59   :  { %1155 = vmatmul.mubr.msk.f32.gmra.mrb[14].mxu0 %vm78_vm0, %v71_v18 }
  0x5a   :  { %1201 = vmatprep.mubr.msk.f32.mxu0 %vm78_vm0, %v1467_v19 }
 0x110   :  { %v1135_v20 = vpop.f32.mrb[0].mxu0 }
 0x111   :  { %v193_v21 = vpop.f32.mrb[1].mxu0 }
 0x112   :  { %v1241_v22 = vpack.c.bf16 %v1135_v20, %v193_v21 }
 0x114   :  { %v1138_v23 = vpop.f32.mrb[2].mxu0  ;;  %1242 = vmatprep.subr.bf16.mxu1 %v1241_v22 }
 0x115   :  { %v203_v24 = vpop.f32.mrb[3].mxu0  ;;  %1244 = vmatpush3.bf16.msra.mxu1 %v1241_v22 }
 0x116   :  { %v1245_v26 = vpack.c.bf16 %v1138_v23, %v203_v24 }
 0x118   :  { %v1141_v28 = vpop.f32.mrb[4].mxu0  ;;  %1162 = vmatmul.mubr.msk.f32.vlgmr.msra.gmra.mrb[0].mxu1 %vm78_vm0, %v1473_v25  ;;  %1246 = vmatprep.subr.bf16.mxu1 %v1245_v26 }
 0x119   :  { %v213_v29 = vpop.f32.mrb[5].mxu0  ;;  %1248 = vmatpush3.bf16.msra.mxu1 %v1245_v26  ;;  %1164 = vmatprep.mubr.msk.f32.mxu1 %vm78_vm0, %v74_v27 }
 0x11a   :  { %v1249_v31 = vpack.c.bf16 %v1141_v28, %v213_v29 }
 0x11c   :  { %v1144_v32 = vpop.f32.mrb[6].mxu0  ;;  %1165 = vmatmul.mubr.msk.f32.gmra.mrb[2].mxu1 %vm78_vm0, %v75_v30  ;;  %1250 = vmatprep.subr.bf16.mxu1 %v1249_v31 }
 0x11d   :  { %v223_v33 = vpop.f32.mrb[7].mxu0  ;;  %1171 = vmatprep.mubr.msk.f32.mxu1 %vm78_vm0, %v1467_v19 }
 0x11e   :  { %v1253_v34 = vpack.c.bf16 %v1144_v32, %v223_v33 }
 0x120   :  { %v1147_v35 = vpop.f32.mrb[8].mxu0  ;;  %1172 = vmatmul.mubr.msk.f32.vlgmr.msra.gmra.mrb[4].mxu1 %vm78_vm0, %v1473_v25 }
 0x121   :  { %1252 = vmatpush3.bf16.msra.mxu1 %v1249_v31  ;;  %v233_v36 = vpop.f32.mrb[9].mxu0  ;;  %1174 = vmatprep.mubr.msk.f32.mxu1 %vm78_vm0, %v74_v27 }
 0x122   :  { %v1257_v37 = vpack.c.bf16 %v1147_v35, %v233_v36  ;;  %1254 = vmatprep.subr.bf16.mxu1 %v1253_v34 }
 0x124   :  { %1175 = vmatmul.mubr.msk.f32.gmra.mrb[6].mxu1 %vm78_vm0, %v75_v30  ;;  %1258 = vmatprep.subr.bf16.mxu0 %v1257_v37  ;;  %v1150_v38 = vpop.f32.mrb[10].mxu0 }
 0x125   :  { %1260 = vmatpush3.bf16.msra.mxu0 %v1257_v37  ;;  %1181 = vmatprep.mubr.msk.f32.mxu1 %vm78_vm0, %v1467_v19  ;;  %v243_v39 = vpop.f32.mrb[11].mxu0 }
 0x126   :  { %v1261_v40 = vpack.c.bf16 %v1150_v38, %v243_v39 }
 0x128   :  { %1182 = vmatmul.mubr.msk.f32.vlgmr.msra.gmra.mrb[8].mxu1 %vm78_vm0, %v1473_v25  ;;  %v1153_v41 = vpop.f32.mrb[12].mxu0  ;;  %1202 = vmatmul.mubr.msk.f32.vlgmr.msra.gmra.mrb[16].mxu0 %vm78_vm0, %v1473_v25 }
 0x129   :  { %1256 = vmatpush3.bf16.msra.mxu1 %v1253_v34  ;;  %1184 = vmatprep.mubr.msk.f32.mxu1 %vm78_vm0, %v74_v27  ;;  %v253_v42 = vpop.f32.mrb[13].mxu0 }
 0x12a   :  { %1262 = vmatprep.subr.bf16.mxu1 %v1261_v40  ;;  %v1265_v43 = vpack.c.bf16 %v1153_v41, %v253_v42  ;;  %1204 = vmatprep.mubr.msk.f32.mxu0 %vm78_vm0, %v74_v27 }
 0x12c   :  { %1185 = vmatmul.mubr.msk.f32.gmra.mrb[10].mxu1 %vm78_vm0, %v75_v30  ;;  %v1156_v44 = vpop.f32.mrb[14].mxu0  ;;  %1266 = vmatprep.subr.bf16.mxu0 %v1265_v43 }
 0x12d   :  { %1191 = vmatprep.mubr.msk.f32.mxu1 %vm78_vm0, %v1467_v19  ;;  %v263_v45 = vpop.f32.mrb[15].mxu0  ;;  %1268 = vmatpush3.bf16.msra.mxu0 %v1265_v43 }
 0x12e   :  { %v1269_v46 = vpack.c.bf16 %v1156_v44, %v263_v45  ;;  %1205 = vmatmul.mubr.msk.f32.gmra.mrb[18].mxu0 %vm78_vm0, %v75_v30 }
 0x12f   :  { %1221 = vmatprep.mubr.msk.f32.mxu0 %vm78_vm0, %v1467_v19 }
 0x130   :  { %1192 = vmatmul.mubr.msk.f32.vlgmr.msra.gmra.mrb[12].mxu1 %vm78_vm0, %v1473_v25 }
 0x131   :  { %1264 = vmatpush3.bf16.msra.mxu1 %v1261_v40  ;;  %1194 = vmatprep.mubr.msk.f32.mxu1 %vm78_vm0, %v74_v27 }
 0x132   :  { %1270 = vmatprep.subr.bf16.mxu1 %v1269_v46  ;;  %1222 = vmatmul.mubr.msk.f32.vlgmr.msra.gmra.mrb[20].mxu0 %vm78_vm0, %v1473_v25 }
 0x133   :  { %1224 = vmatprep.mubr.msk.f32.mxu0 %vm78_vm0, %v74_v27 }
 0x134   :  { %1195 = vmatmul.mubr.msk.f32.gmra.mrb[14].mxu1 %vm78_vm0, %v75_v30 }
 0x135   :  { %1211 = vmatprep.mubr.msk.f32.mxu1 %vm78_vm0, %v1467_v19 }
 0x136   :  { %1225 = vmatmul.mubr.msk.f32.gmra.mrb[22].mxu0 %vm78_vm0, %v75_v30 }
 0x138   :  { %1212 = vmatmul.mubr.msk.f32.vlgmr.msra.gmra.mrb[16].mxu1 %vm78_vm0, %v1473_v25 }
 0x139   :  { %1272 = vmatpush3.bf16.msra.mxu1 %v1269_v46  ;;  %1214 = vmatprep.mubr.msk.f32.mxu1 %vm78_vm0, %v74_v27 }
 0x13c   :  { %1215 = vmatmul.mubr.msk.f32.gmra.mrb[18].mxu1 %vm78_vm0, %v75_v30 }
 0x13d   :  { %1231 = vmatprep.mubr.msk.f32.mxu1 %vm78_vm0, %v1467_v19 }
 0x140   :  { %1232 = vmatmul.mubr.msk.f32.vlgmr.msra.gmra.mrb[20].mxu1 %vm78_vm0, %v1473_v25 }
 0x141   :  { %1234 = vmatprep.mubr.msk.f32.mxu1 %vm78_vm0, %v74_v27 }
 0x144   :  { %1235 = vmatmul.mubr.msk.f32.gmra.mrb[22].mxu1 %vm78_vm0, %v75_v30 }
 0x1eb   :  { %v1163_v47 = vpop.f32.mrb[0].mxu1 }
 0x1ec   :  { %966 = vst.msk [vmem:[#allocation8 + $0x8] sm:$0xff] %vm964_vm1, %v1163_v47  ;;  %v350_v48 = vpop.f32.mrb[1].mxu1 }
 0x1ed   :  { %965 = vst.msk [vmem:[#allocation8] sm:$0xff] %vm964_vm1, %v350_v48 }
 0x1ef   :  { %v1166_v49 = vpop.f32.mrb[2].mxu1 }
 0x1f0   :  { %968 = vst.msk [vmem:[#allocation8 + $0x18] sm:$0xff] %vm964_vm1, %v1166_v49  ;;  %v360_v50 = vpop.f32.mrb[3].mxu1 }
 0x1f1   :  { %967 = vst.msk [vmem:[#allocation8 + $0x10] sm:$0xff] %vm964_vm1, %v360_v50 }
 0x1f3   :  { %v1173_v51 = vpop.f32.mrb[4].mxu1 }
 0x1f4   :  { %970 = vst.msk [vmem:[#allocation8 + $0x28] sm:$0xff] %vm964_vm1, %v1173_v51  ;;  %v435_v52 = vpop.f32.mrb[5].mxu1 }
 0x1f5   :  { %969 = vst.msk [vmem:[#allocation8 + $0x20] sm:$0xff] %vm964_vm1, %v435_v52 }
 0x1f7   :  { %v1176_v53 = vpop.f32.mrb[6].mxu1 }
 0x1f8   :  { %972 = vst.msk [vmem:[#allocation8 + $0x38] sm:$0xff] %vm964_vm1, %v1176_v53  ;;  %v445_v54 = vpop.f32.mrb[7].mxu1 }
 0x1f9   :  { %971 = vst.msk [vmem:[#allocation8 + $0x30] sm:$0xff] %vm964_vm1, %v445_v54 }
 0x1fb   :  { %v1183_v55 = vpop.f32.mrb[8].mxu1  ;;  %v1203_v56 = vpop.f32.mrb[16].mxu0 }
 0x1fc   :  { %974 = vst.msk [vmem:[#allocation8 + $0x48] sm:$0xff] %vm964_vm1, %v1183_v55  ;;  %v520_v57 = vpop.f32.mrb[9].mxu1  ;;  %982 = vst.msk [vmem:[#allocation8 + $0x88] sm:$0xff] %vm964_vm1, %v1203_v56  ;;  %v690_v58 = vpop.f32.mrb[17].mxu0 }
 0x1fd   :  { %973 = vst.msk [vmem:[#allocation8 + $0x40] sm:$0xff] %vm964_vm1, %v520_v57  ;;  %981 = vst.msk [vmem:[#allocation8 + $0x80] sm:$0xff] %vm964_vm1, %v690_v58 }
 0x1ff   :  { %v1186_v59 = vpop.f32.mrb[10].mxu1 }
 0x200   :  { %976 = vst.msk [vmem:[#allocation8 + $0x58] sm:$0xff] %vm964_vm1, %v1186_v59  ;;  %v530_v60 = vpop.f32.mrb[11].mxu1 }
 0x201   :  { %975 = vst.msk [vmem:[#allocation8 + $0x50] sm:$0xff] %vm964_vm1, %v530_v60  ;;  %v1206_v61 = vpop.f32.mrb[18].mxu0 }
 0x202   :  { %984 = vst.msk [vmem:[#allocation8 + $0x98] sm:$0xff] %vm964_vm1, %v1206_v61  ;;  %v700_v62 = vpop.f32.mrb[19].mxu0 }
 0x203   :  { %v1193_v63 = vpop.f32.mrb[12].mxu1  ;;  %983 = vst.msk [vmem:[#allocation8 + $0x90] sm:$0xff] %vm964_vm1, %v700_v62 }
 0x204   :  { %978 = vst.msk [vmem:[#allocation8 + $0x68] sm:$0xff] %vm964_vm1, %v1193_v63  ;;  %v605_v0 = vpop.f32.mrb[13].mxu1 }
 0x205   :  { %977 = vst.msk [vmem:[#allocation8 + $0x60] sm:$0xff] %vm964_vm1, %v605_v0  ;;  %v1223_v1 = vpop.f32.mrb[20].mxu0 }
 0x206   :  { %990 = vst.msk [vmem:[#allocation8 + $0xc8] sm:$0xff] %vm964_vm1, %v1223_v1  ;;  %v860_v2 = vpop.f32.mrb[21].mxu0 }
 0x207   :  { %v1196_v3 = vpop.f32.mrb[14].mxu1  ;;  %989 = vst.msk [vmem:[#allocation8 + $0xc0] sm:$0xff] %vm964_vm1, %v860_v2 }
 0x208   :  { %980 = vst.msk [vmem:[#allocation8 + $0x78] sm:$0xff] %vm964_vm1, %v1196_v3  ;;  %v615_v4 = vpop.f32.mrb[15].mxu1 }
 0x209   :  { %979 = vst.msk [vmem:[#allocation8 + $0x70] sm:$0xff] %vm964_vm1, %v615_v4  ;;  %v1226_v5 = vpop.f32.mrb[22].mxu0 }
 0x20a   :  { %992 = vst.msk [vmem:[#allocation8 + $0xd8] sm:$0xff] %vm964_vm1, %v1226_v5  ;;  %v870_v6 = vpop.f32.mrb[23].mxu0 }
 0x20b   :  { %v1213_v7 = vpop.f32.mrb[16].mxu1  ;;  %991 = vst.msk [vmem:[#allocation8 + $0xd0] sm:$0xff] %vm964_vm1, %v870_v6 }
 0x20c   :  { %986 = vst.msk [vmem:[#allocation8 + $0xa8] sm:$0xff] %vm964_vm1, %v1213_v7  ;;  %v775_v8 = vpop.f32.mrb[17].mxu1 }
 0x20d   :  { %985 = vst.msk [vmem:[#allocation8 + $0xa0] sm:$0xff] %vm964_vm1, %v775_v8 }
 0x20f   :  { %v1216_v9 = vpop.f32.mrb[18].mxu1 }
 0x210   :  { %988 = vst.msk [vmem:[#allocation8 + $0xb8] sm:$0xff] %vm964_vm1, %v1216_v9  ;;  %v785_v10 = vpop.f32.mrb[19].mxu1 }
 0x211   :  { %987 = vst.msk [vmem:[#allocation8 + $0xb0] sm:$0xff] %vm964_vm1, %v785_v10 }
 0x213   :  { %v1233_v11 = vpop.f32.mrb[20].mxu1 }
 0x214   :  { %994 = vst.msk [vmem:[#allocation8 + $0xe8] sm:$0xff] %vm964_vm1, %v1233_v11  ;;  %v945_v12 = vpop.f32.mrb[21].mxu1 }
 0x215   :  { %993 = vst.msk [vmem:[#allocation8 + $0xe0] sm:$0xff] %vm964_vm1, %v945_v12 }
 0x217   :  { %v1236_v13 = vpop.f32.mrb[22].mxu1 }
 0x218   :  { %996 = vst.msk [vmem:[#allocation8 + $0xf8] sm:$0xff] %vm964_vm1, %v1236_v13  ;;  %v955_v14 = vpop.f32.mrb[23].mxu1 }
 0x219   :  { %995 = vst.msk [vmem:[#allocation8 + $0xf0] sm:$0xff] %vm964_vm1, %v955_v14 }
 0x21a   :  { %1356 = shalt.err (!%p1353_p0)
}
 0x21b   :  { %s1357_s27 = scalar_lea.hbm %s1569_s3, 4096 }
 0x21c   :  { %p1358_p1 = scmp.ne.s32.totalorder %s1569_s3, %s1357_s27  ;;  %p1361_p2 = scmp.lt.u32.totalorder %s1357_s27, %s1569_s3 }
 0x21e   :  { %p1363_p3 = pnand %p1361_p2, %p1358_p1 }
 0x220   :  { %1366 = shalt.err (!%p1363_p3)
}
 0x221   :  { %1008 = dma.vmem_to_hbm [thread:$0]  %s1003_s21, 4096, %s1569_s3, [#allocation4], %s1375_s24, %s1375_s24, %s1376_s25  }
 0x222   :  { %1371 = dma.done.wait [#allocation4], 4096  }
 0x223   :  { %1372 = vsyncadd [#allocation4], 4294963200 }
 0x224   :  { %1012 = vsyncpa [#allocation3], 1 }
 0x225   :  { %1013 = vsyncpa [#allocation6], 1 }
 0x226   :  { %1014 = vsyncpa [#allocation4], 1 }

</bundles_post_ra>
